<compile_context>
chip_gen: v6e
topology: v6e:2x2x1
jax: 0.10.0
libtpu: 0.0.40
codegen_flags: <defaults>
</compile_context>

<pallas_src>
import jax
import jax.numpy as jnp
from jax import lax
from jax.experimental import pallas as pl
from jax.experimental.pallas import tpu as pltpu

_LANE = 128
_SUB = 8
_NEG_SLOPE = 0.2
_VMEM = pl.BlockSpec(memory_space=pltpu.MemorySpace.VMEM)


def _round_up(x, m):
    return ((x + m - 1) // m) * m


def _pad2(a, rows, cols):
    out = jnp.zeros((rows, cols), a.dtype)
    return out.at[: a.shape[0], : a.shape[1]].set(a)


def _vmem_limit_bytes():
    # ~3/4 of physical VMEM (96 MiB on v5e/v6e, 48 MiB on v7x), leaving headroom for the
    # BlockSpec double buffers.
    try:
        cap = int(getattr(pltpu.get_tpu_info(), "vmem_capacity_bytes", 64 << 20))
    except Exception:
        cap = 64 << 20
    return int(min(cap * 3 // 4, 100 << 20))


# ---------------------------------------------------------------------------
# Fused GAT layer stack: grid = (layers, query-row tiles)
# ---------------------------------------------------------------------------
def _make_gat_stack_kernel(tq):
    def kernel(x_ref, w_ref, asrc_ref, adst_ref, b_ref, adj_ref, o_ref,
               act_ref, xw_ref, ssrc_ref, sdst_ref):
        l = pl.program_id(0)
        r = pl.program_id(1)

        # One-time: seed the activation carry with the zero-padded input features.
        @pl.when(jnp.logical_and(l == 0, r == 0))
        def _():
            act_ref[...] = x_ref[...]

        # Once per layer: x' = act @ W (bf16 MXU, f32 accumulation) plus the per-node
        # attention terms a_src . x'_j (row vector) and a_dst . x'_i (column vector).
        @pl.when(r == 0)
        def _():
            xw = jnp.dot(act_ref[...], w_ref[...],
                         preferred_element_type=jnp.float32)                 # (Nc, F) f32
            xw_ref[...] = xw.astype(jnp.bfloat16)
            ssrc_ref[...] = lax.dot_general(
                asrc_ref[...], xw, (((1,), (1,)), ((), ())),
                preferred_element_type=jnp.float32)                          # (1, Nc)
            sdst_ref[...] = jnp.sum(xw * adst_ref[...], axis=-1,
                                    keepdims=True)                           # (Nc, 1)

        # Row tile of attention logits + masked softmax + aggregation.
        row0 = pl.multiple_of(r * tq, tq)
        e = sdst_ref[pl.ds(row0, tq), :] + ssrc_ref[...]                     # (TQ, Nc) f32
        e = jnp.maximum(e, _NEG_SLOPE * e)                                   # LeakyReLU
        e = jnp.where(adj_ref[...] != 0, e, -1e30)                           # int8 mask
        e = e - jnp.max(e, axis=-1, keepdims=True)                           # stable
        p = jnp.exp(e)                                                       # masked -> 0
        attn = p * pl.reciprocal(jnp.sum(p, axis=-1, keepdims=True), approx=True)

        out = jnp.dot(attn.astype(jnp.bfloat16), xw_ref[...],
                      preferred_element_type=jnp.float32) + b_ref[...]
        out_bf = out.astype(jnp.bfloat16)
        o_ref[...] = out_bf                                                  # lane-dense
        act_ref[pl.ds(row0, tq), :] = out_bf                                 # layer carry
    return kernel


def gat_stack(x_pad, w_stack, asrc_stack, adst_stack, b_stack, adj, tq, r_tiles):
    n_layers = w_stack.shape[0]
    n_c, f_pad = x_pad.shape
    n_r = adj.shape[0]
    return pl.pallas_call(
        _make_gat_stack_kernel(tq),
        out_shape=jax.ShapeDtypeStruct((n_r, f_pad), jnp.bfloat16),
        grid_spec=pltpu.PrefetchScalarGridSpec(
            num_scalar_prefetch=0,
            grid=(n_layers, r_tiles),
            in_specs=[
                pl.BlockSpec((n_c, f_pad), lambda l, r: (0, 0)),             # x (resident)
                pl.BlockSpec((None, f_pad, f_pad), lambda l, r: (l, 0, 0)),  # W[l]
                pl.BlockSpec((None, 1, f_pad), lambda l, r: (l, 0, 0)),      # a_src[l]
                pl.BlockSpec((None, 1, f_pad), lambda l, r: (l, 0, 0)),      # a_dst[l]
                pl.BlockSpec((None, 1, f_pad), lambda l, r: (l, 0, 0)),      # bias[l]
                # Adjacency row tile (int8); on v5e raise pipeline_mode=pl.Buffered(3)
                # if profiling shows this DMA exposed.
                pl.BlockSpec((tq, n_c), lambda l, r: (r, 0)),
            ],
            out_specs=pl.BlockSpec((tq, f_pad), lambda l, r: (r, 0)),
            scratch_shapes=[
                pltpu.VMEM((n_c, f_pad), jnp.bfloat16),   # activation carry
                pltpu.VMEM((n_c, f_pad), jnp.bfloat16),   # x'W keys/values
                pltpu.VMEM((1, n_c), jnp.float32),        # a_src . x'_j
                pltpu.VMEM((n_c, 1), jnp.float32),        # a_dst . x'_i
            ]),
        # TODO(synk): the fused layer stack carries activations in per-core VMEM scratch,
        # so the row axis must stay sequential; for very large N on v7x, split per layer
        # and mark the row-tile axis "parallel" to use both TensorCores.
        compiler_params=pltpu.CompilerParams(
            dimension_semantics=("arbitrary", "arbitrary"),
            vmem_limit_bytes=_vmem_limit_bytes()),
    )(x_pad, w_stack, asrc_stack, adst_stack, b_stack, adj)


# ---------------------------------------------------------------------------
# Fused global_mean_pool + MLP tail (single pallas_call, whole arrays in VMEM)
# ---------------------------------------------------------------------------
def _make_pool_mlp_kernel(num_layers):
    def kernel(*refs):
        onehot_ref, invc_ref, h_ref = refs[0], refs[1], refs[2]
        wb_refs = refs[3:3 + 2 * num_layers]
        o_ref = refs[3 + 2 * num_layers]
        out = jnp.dot(onehot_ref[...], h_ref[...],
                      preferred_element_type=jnp.float32) * invc_ref[...]    # mean pool
        for i in range(num_layers):
            w_ref, b_ref = wb_refs[2 * i], wb_refs[2 * i + 1]
            out = jnp.dot(out.astype(jnp.bfloat16), w_ref[...],
                          preferred_element_type=jnp.float32) + b_ref[...]
            out = jnp.maximum(out, 0.0)                    # act after EVERY linear
        o_ref[...] = out
    return kernel


def pool_mlp(onehot_bf, inv_counts, h, mlp_params):
    g_pad, n_rows = onehot_bf.shape
    f_pad = h.shape[1]
    out_pad = mlp_params[-1][0].shape[1] if mlp_params else f_pad
    flat = []
    for (w, b) in mlp_params:
        flat += [w, b]
    flops = 2 * g_pad * n_rows * f_pad + sum(
        2 * g_pad * w.shape[0] * w.shape[1] for (w, _) in mlp_params)
    bytes_accessed = (onehot_bf.size * 2 + inv_counts.size * 4 + h.size * 2 +
                      sum(w.size * 2 + b.size * 4 for (w, b) in mlp_params) +
                      g_pad * out_pad * 4)
    return pl.pallas_call(
        _make_pool_mlp_kernel(len(mlp_params)),
        out_shape=jax.ShapeDtypeStruct((g_pad, out_pad), jnp.float32),
        in_specs=[_VMEM] * (3 + len(flat)),
        out_specs=_VMEM,
        compiler_params=pltpu.CompilerParams(vmem_limit_bytes=_vmem_limit_bytes()),
        cost_estimate=pl.CostEstimate(flops=int(flops), transcendentals=0,
                                      bytes_accessed=int(bytes_accessed)),
    )(onehot_bf, inv_counts, h, *flat)


# ---------------------------------------------------------------------------
# Model: parameter init + forward (glue in plain JAX)
# ---------------------------------------------------------------------------
def init_params(key, input_dim, output_dim, graph_hidden_dims, mlp_hidden_dims):
    graph_dims = [input_dim] + list(graph_hidden_dims)
    mlp_dims = list(mlp_hidden_dims) + [output_dim]
    # Common padded feature width for the whole GAT stack so layer weights can be stacked.
    f_pad = max(_round_up(d, _LANE) for d in graph_dims)

    ws, asrcs, adsts, bs = [], [], [], []
    for i in range(len(graph_dims) - 1):
        key, k1, k2, k3 = jax.random.split(key, 4)
        fi, fo = graph_dims[i], graph_dims[i + 1]
        w = jax.random.normal(k1, (fi, fo), jnp.float32) * 0.1      # GATConv.lin weight
        a_src = jax.random.normal(k2, (1, fo), jnp.float32) * 0.1   # att_src
        a_dst = jax.random.normal(k3, (1, fo), jnp.float32) * 0.1   # att_dst
        b = jnp.zeros((1, fo), jnp.float32)                         # GATConv bias
        ws.append(_pad2(w, f_pad, f_pad))
        asrcs.append(_pad2(a_src, 1, f_pad))
        adsts.append(_pad2(a_dst, 1, f_pad))
        bs.append(_pad2(b, 1, f_pad))
    gat = None
    if ws:
        gat = {"w": jnp.stack(ws).astype(jnp.bfloat16),   # (L, F_pad, F_pad) bf16
               "a_src": jnp.stack(asrcs),                 # (L, 1, F_pad) f32
               "a_dst": jnp.stack(adsts),
               "b": jnp.stack(bs)}

    mlp = []
    prev_pad = f_pad
    for i in range(len(mlp_dims) - 1):
        key, k1 = jax.random.split(key)
        di, do = mlp_dims[i], mlp_dims[i + 1]
        di_p = prev_pad if i == 0 else _round_up(di, _LANE)
        do_p = _round_up(do, _LANE)
        w = jax.random.normal(k1, (di, do), jnp.float32) * 0.1
        b = jnp.zeros((1, do), jnp.float32)
        mlp.append((_pad2(w, di_p, do_p).astype(jnp.bfloat16), _pad2(b, 1, do_p)))
        prev_pad = do_p
    return {"gat": gat, "mlp": mlp, "f_pad": f_pad, "output_dim": output_dim}


def gat_model_forward(x, edge_index, batch, params, num_graphs):
    n, _ = x.shape
    f_pad = params["f_pad"]

    # Node padding: key/column axis to a multiple of 128 (lane-dense), query rows only to
    # the row-tile size so pad-only row tiles are skipped for small graphs.
    n_c = _round_up(n, _LANE)
    if n <= 256:
        tq = _round_up(n, _SUB)
        r_tiles = 1
    else:
        tq = 256 if n_c % 256 == 0 else _LANE
        r_tiles = pl.cdiv(n, tq)
    n_r = tq * r_tiles

    x_pad = _pad2(x.astype(jnp.float32), n_c, f_pad).astype(jnp.bfloat16)

    if params["gat"] is not None:
        # Single int8 adjacency adj[target, source] with self loops on every (padded)
        # query row; duplicate edges collapse to one entry.
        adj = jnp.zeros((n_r, n_c), jnp.int8)
        adj = adj.at[edge_index[1], edge_index[0]].set(1)
        diag = jnp.arange(n_r)
        adj = adj.at[diag, diag].set(1)
        h = gat_stack(x_pad, params["gat"]["w"], params["gat"]["a_src"],
                      params["gat"]["a_dst"], params["gat"]["b"], adj, tq, r_tiles)
    else:
        h = x_pad   # no graph conv layers configured

    # global_mean_pool: exact 0/1 one-hot (bf16) matmul + f32 reciprocal counts in-kernel.
    # Padded nodes get segment -1 so they match no graph row.
    n_rows = h.shape[0]
    g_pad = _round_up(max(num_graphs, 1), _SUB)
    seg = jnp.full((n_rows,), -1, jnp.int32).at[:n].set(batch.astype(jnp.int32))
    onehot = seg[None, :] == jnp.arange(g_pad, dtype=jnp.int32)[:, None]
    counts = jnp.sum(onehot, axis=1, keepdims=True).astype(jnp.float32)
    inv_counts = 1.0 / jnp.maximum(counts, 1.0)

    out = pool_mlp(onehot.astype(jnp.bfloat16), inv_counts, h, params["mlp"])
    return out[:num_graphs, : params["output_dim"]]


if __name__ == "__main__":
    key = jax.random.PRNGKey(0)

    # small problem: 2 graphs of 8 nodes each (ring graphs), input_dim=8
    N, G = 16, 2
    input_dim, graph_hidden_dims, mlp_hidden_dims, output_dim = 8, [16, 32], [32], 4

    key, kx = jax.random.split(key)
    x = jax.random.normal(kx, (N, input_dim), jnp.float32)

    src, dst = [], []
    for g in range(G):
        for i in range(8):
            a = g * 8 + i
            b = g * 8 + (i + 1) % 8
            src += [a, b]
            dst += [b, a]
    edge_index = jnp.array([src, dst], dtype=jnp.int32)        # (2, 32): row0=src, row1=dst
    batch = jnp.array([0] * 8 + [1] * 8, dtype=jnp.int32)      # (16,)

    params = init_params(key, input_dim, output_dim, graph_hidden_dims, mlp_hidden_dims)

    out = gat_model_forward(x, edge_index, batch, params, num_graphs=G)
    out = jax.block_until_ready(out)
    assert out.shape == (G, output_dim)
    print("KERNEL_OK")
</pallas_src>

<mosaic_0001>
module attributes {stable_mosaic.version = 11 : i64} {
  func.func @kernel(%arg0: i32, %arg1: i32, %arg2: memref<128x128xbf16, #tpu.memory_space<vmem>>, %arg3: memref<1x128x128xbf16, #tpu.memory_space<vmem>>, %arg4: memref<1x1x128xf32, #tpu.memory_space<vmem>>, %arg5: memref<1x1x128xf32, #tpu.memory_space<vmem>>, %arg6: memref<1x1x128xf32, #tpu.memory_space<vmem>>, %arg7: memref<16x128xi8, #tpu.memory_space<vmem>>, %arg8: memref<16x128xbf16, #tpu.memory_space<vmem>>, %arg9: memref<128x128xbf16, #tpu.memory_space<vmem>>, %arg10: memref<128x128xbf16, #tpu.memory_space<vmem>>, %arg11: memref<1x128xf32, #tpu.memory_space<vmem>>, %arg12: memref<128x1xf32, #tpu.memory_space<vmem>>) attributes {dimension_semantics = [#tpu.dimension_semantics<arbitrary>, #tpu.dimension_semantics<arbitrary>], iteration_bounds = array<i64: 2, 1>, scalar_prefetch = 0 : i64, scratch_operands = 4 : i64, tpu.core_type = #tpu.core_type<tc>, window_params = [{pipeline_mode = #tpu.pipeline_mode<synchronous>, transform_indices = @transform_0, window_bounds = array<i64: 128, 128>}, {transform_indices = @transform_1, window_bounds = array<i64: 1, 128, 128>}, {transform_indices = @transform_2, window_bounds = array<i64: 1, 1, 128>}, {transform_indices = @transform_3, window_bounds = array<i64: 1, 1, 128>}, {transform_indices = @transform_4, window_bounds = array<i64: 1, 1, 128>}, {transform_indices = @transform_5, window_bounds = array<i64: 16, 128>}, {transform_indices = @transform_6, window_bounds = array<i64: 16, 128>}]} {
    %c0_i32 = arith.constant 0 : i32
    %0 = arith.cmpi eq, %arg0, %c0_i32 : i32
    %c0_i32_0 = arith.constant 0 : i32
    %1 = arith.cmpi eq, %arg1, %c0_i32_0 : i32
    %2 = arith.andi %0, %1 : i1
    %3 = arith.extui %2 : i1 to i32
    %c0_i32_1 = arith.constant 0 : i32
    %4 = arith.cmpi ne, %3, %c0_i32_1 : i32
    scf.if %4 {
      %c0_20 = arith.constant 0 : index
      %c0_21 = arith.constant 0 : index
      %45 = vector.load %arg2[%c0_20, %c0_21] : memref<128x128xbf16, #tpu.memory_space<vmem>>, vector<128x128xbf16>
      %c0_22 = arith.constant 0 : index
      %c0_23 = arith.constant 0 : index
      %46 = vector.load %arg9[%c0_22, %c0_23] : memref<128x128xbf16, #tpu.memory_space<vmem>>, vector<128x128xbf16>
      tpu.vector_store %arg9[%c0_22, %c0_23], %45 {strides = array<i32>} : memref<128x128xbf16, #tpu.memory_space<vmem>>, vector<128x128xbf16>,
    } else {
    }
    %c0_i32_2 = arith.constant 0 : i32
    %5 = arith.cmpi eq, %arg1, %c0_i32_2 : i32
    %6 = arith.extui %5 : i1 to i32
    %c0_i32_3 = arith.constant 0 : i32
    %7 = arith.cmpi ne, %6, %c0_i32_3 : i32
    scf.if %7 {
      %c0_20 = arith.constant 0 : index
      %c0_21 = arith.constant 0 : index
      %45 = vector.load %arg9[%c0_20, %c0_21] : memref<128x128xbf16, #tpu.memory_space<vmem>>, vector<128x128xbf16>
      %c0_22 = arith.constant 0 : index
      %c0_23 = arith.constant 0 : index
      %c0_24 = arith.constant 0 : index
      %46 = vector.load %arg3[%c0_22, %c0_23, %c0_24] : memref<1x128x128xbf16, #tpu.memory_space<vmem>>, vector<1x128x128xbf16>
      %47 = vector.shape_cast %46 : vector<1x128x128xbf16> to vector<128x128xbf16>
      %cst_25 = arith.constant dense<0.000000e+00> : vector<128x128xf32>
      %48 = tpu.matmul %45, %47, %cst_25 {dimension_numbers = #tpu.dot_dimension_numbers<[1], [0], [0], [1], [0, 0, 1, 1], [], []>} : vector<128x128xbf16>, vector<128x128xbf16>, vector<128x128xf32> -> vector<128x128xf32>
      %49 = arith.truncf %48 : vector<128x128xf32> to vector<128x128xbf16>
      %c0_26 = arith.constant 0 : index
      %c0_27 = arith.constant 0 : index
      %50 = vector.load %arg10[%c0_26, %c0_27] : memref<128x128xbf16, #tpu.memory_space<vmem>>, vector<128x128xbf16>
      tpu.vector_store %arg10[%c0_26, %c0_27], %49 {strides = array<i32>} : memref<128x128xbf16, #tpu.memory_space<vmem>>, vector<128x128xbf16>,
      %c0_28 = arith.constant 0 : index
      %c0_29 = arith.constant 0 : index
      %c0_30 = arith.constant 0 : index
      %51 = vector.load %arg4[%c0_28, %c0_29, %c0_30] : memref<1x1x128xf32, #tpu.memory_space<vmem>>, vector<1x1x128xf32>
      %52 = vector.shape_cast %51 : vector<1x1x128xf32> to vector<1x128xf32>
      %cst_31 = arith.constant dense<0.000000e+00> : vector<1x128xf32>
      %53 = tpu.matmul %52, %48, %cst_31 {dimension_numbers = #tpu.dot_dimension_numbers<[1], [1], [0], [0], [0, 0, 1, 0], [], []>} : vector<1x128xf32>, vector<128x128xf32>, vector<1x128xf32> -> vector<1x128xf32>
      %c0_32 = arith.constant 0 : index
      %c0_33 = arith.constant 0 : index
      %54 = vector.load %arg11[%c0_32, %c0_33] : memref<1x128xf32, #tpu.memory_space<vmem>>, vector<1x128xf32>
      tpu.vector_store %arg11[%c0_32, %c0_33], %53 {strides = array<i32>} : memref<1x128xf32, #tpu.memory_space<vmem>>, vector<1x128xf32>,
      %c0_34 = arith.constant 0 : index
      %c0_35 = arith.constant 0 : index
      %c0_36 = arith.constant 0 : index
      %55 = vector.load %arg5[%c0_34, %c0_35, %c0_36] : memref<1x1x128xf32, #tpu.memory_space<vmem>>, vector<1x1x128xf32>
      %56 = vector.shape_cast %55 : vector<1x1x128xf32> to vector<1x128xf32>
      %57 = vector.broadcast %56 : vector<1x128xf32> to vector<128x128xf32>
      %58 = arith.mulf %48, %57 : vector<128x128xf32>
      %cst_37 = arith.constant dense<0.000000e+00> : vector<128xf32>
      %59 = vector.multi_reduction <add>, %58, %cst_37 [1] : vector<128x128xf32> to vector<128xf32>
      %60 = vector.shape_cast %59 : vector<128xf32> to vector<128x1xf32>
      %c0_38 = arith.constant 0 : index
      %c0_39 = arith.constant 0 : index
      %61 = vector.load %arg12[%c0_38, %c0_39] : memref<128x1xf32, #tpu.memory_space<vmem>>, vector<128x1xf32>
      tpu.vector_store %arg12[%c0_38, %c0_39], %60 {strides = array<i32>} : memref<128x1xf32, #tpu.memory_space<vmem>>, vector<128x1xf32>,
    } else {
    }
    %c16_i32 = arith.constant 16 : i32
    %8 = arith.muli %arg1, %c16_i32 : i32
    %9 = tpu.assume_multiple %8, 16 : i32
    %10 = arith.index_cast %9 : i32 to index
    %c0 = arith.constant 0 : index
    %11 = vector.load %arg12[%10, %c0] : memref<128x1xf32, #tpu.memory_space<vmem>>, vector<16x1xf32>
    %c0_4 = arith.constant 0 : index
    %c0_5 = arith.constant 0 : index
    %12 = vector.load %arg11[%c0_4, %c0_5] : memref<1x128xf32, #tpu.memory_space<vmem>>, vector<1x128xf32>
    %13 = vector.broadcast %11 : vector<16x1xf32> to vector<16x128xf32>
    %14 = vector.broadcast %12 : vector<1x128xf32> to vector<16x128xf32>
    %15 = arith.addf %13, %14 : vector<16x128xf32>
    %cst = arith.constant 2.000000e-01 : f32
    %16 = vector.broadcast %cst : f32 to vector<16x128xf32>
    %17 = arith.mulf %16, %15 : vector<16x128xf32>
    %18 = arith.maximumf %15, %17 : vector<16x128xf32>
    %c0_6 = arith.constant 0 : index
    %c0_7 = arith.constant 0 : index
    %19 = vector.load %arg7[%c0_6, %c0_7] : memref<16x128xi8, #tpu.memory_space<vmem>>, vector<16x128xi8>
    %c0_i8 = arith.constant 0 : i8
    %20 = vector.broadcast %c0_i8 : i8 to vector<16x128xi8>
    %21 = arith.cmpi ne, %19, %20 : vector<16x128xi8>
    %cst_8 = arith.constant -1.000000e+30 : f32
    %22 = vector.broadcast %cst_8 : f32 to vector<16x128xf32>
    %23 = arith.select %21, %18, %22 : vector<16x128xi1>, vector<16x128xf32>
    %cst_9 = arith.constant dense<0xFF800000> : vector<16xf32>
    %24 = vector.multi_reduction <maximumf>, %23, %cst_9 [1] : vector<16x128xf32> to vector<16xf32>
    %25 = vector.shape_cast %24 : vector<16xf32> to vector<16x1xf32>
    %26 = vector.broadcast %25 : vector<16x1xf32> to vector<16x128xf32>
    %27 = arith.subf %23, %26 : vector<16x128xf32>
    %28 = math.exp %27 : vector<16x128xf32>
    %cst_10 = arith.constant dense<0.000000e+00> : vector<16xf32>
    %29 = vector.multi_reduction <add>, %28, %cst_10 [1] : vector<16x128xf32> to vector<16xf32>
    %30 = vector.shape_cast %29 : vector<16xf32> to vector<16x1xf32>
    %31 = tpu.reciprocal %30 {approx = true} : vector<16x1xf32> -> vector<16x1xf32>
    %32 = vector.broadcast %31 : vector<16x1xf32> to vector<16x128xf32>
    %33 = arith.mulf %28, %32 : vector<16x128xf32>
    %34 = arith.truncf %33 : vector<16x128xf32> to vector<16x128xbf16>
    %c0_11 = arith.constant 0 : index
    %c0_12 = arith.constant 0 : index
    %35 = vector.load %arg10[%c0_11, %c0_12] : memref<128x128xbf16, #tpu.memory_space<vmem>>, vector<128x128xbf16>
    %cst_13 = arith.constant dense<0.000000e+00> : vector<16x128xf32>
    %36 = tpu.matmul %34, %35, %cst_13 {dimension_numbers = #tpu.dot_dimension_numbers<[1], [0], [0], [1], [0, 0, 1, 1], [], []>} : vector<16x128xbf16>, vector<128x128xbf16>, vector<16x128xf32> -> vector<16x128xf32>
    %c0_14 = arith.constant 0 : index
    %c0_15 = arith.constant 0 : index
    %c0_16 = arith.constant 0 : index
    %37 = vector.load %arg6[%c0_14, %c0_15, %c0_16] : memref<1x1x128xf32, #tpu.memory_space<vmem>>, vector<1x1x128xf32>
    %38 = vector.shape_cast %37 : vector<1x1x128xf32> to vector<1x128xf32>
    %39 = vector.broadcast %38 : vector<1x128xf32> to vector<16x128xf32>
    %40 = arith.addf %36, %39 : vector<16x128xf32>
    %41 = arith.truncf %40 : vector<16x128xf32> to vector<16x128xbf16>
    %c0_17 = arith.constant 0 : index
    %c0_18 = arith.constant 0 : index
    %42 = vector.load %arg8[%c0_17, %c0_18] : memref<16x128xbf16, #tpu.memory_space<vmem>>, vector<16x128xbf16>
    tpu.vector_store %arg8[%c0_17, %c0_18], %41 {strides = array<i32>} : memref<16x128xbf16, #tpu.memory_space<vmem>>, vector<16x128xbf16>,
    %43 = arith.index_cast %9 : i32 to index
    %c0_19 = arith.constant 0 : index
    %44 = vector.load %arg9[%43, %c0_19] : memref<128x128xbf16, #tpu.memory_space<vmem>>, vector<16x128xbf16>
    tpu.vector_store %arg9[%43, %c0_19], %41 {strides = array<i32>} : memref<128x128xbf16, #tpu.memory_space<vmem>>, vector<16x128xbf16>,
    return
  }
  func.func @transform_0(%arg0: i32, %arg1: i32) -> (i32, i32) {
    %c0_i32 = arith.constant 0 : i32
    %c0_i32_0 = arith.constant 0 : i32
    %c0_i32_1 = arith.constant 0 : i32
    return %c0_i32, %c0_i32_0 : i32, i32
  }
  func.func @transform_1(%arg0: i32, %arg1: i32) -> (i32, i32, i32) {
    %c0_i32 = arith.constant 0 : i32
    %c0_i32_0 = arith.constant 0 : i32
    %c0_i32_1 = arith.constant 0 : i32
    return %arg0, %c0_i32, %c0_i32_0 : i32, i32, i32
  }
  func.func @transform_2(%arg0: i32, %arg1: i32) -> (i32, i32, i32) {
    %c0_i32 = arith.constant 0 : i32
    %c0_i32_0 = arith.constant 0 : i32
    %c0_i32_1 = arith.constant 0 : i32
    return %arg0, %c0_i32, %c0_i32_0 : i32, i32, i32
  }
  func.func @transform_3(%arg0: i32, %arg1: i32) -> (i32, i32, i32) {
    %c0_i32 = arith.constant 0 : i32
    %c0_i32_0 = arith.constant 0 : i32
    %c0_i32_1 = arith.constant 0 : i32
    return %arg0, %c0_i32, %c0_i32_0 : i32, i32, i32
  }
  func.func @transform_4(%arg0: i32, %arg1: i32) -> (i32, i32, i32) {
    %c0_i32 = arith.constant 0 : i32
    %c0_i32_0 = arith.constant 0 : i32
    %c0_i32_1 = arith.constant 0 : i32
    return %arg0, %c0_i32, %c0_i32_0 : i32, i32, i32
  }
  func.func @transform_5(%arg0: i32, %arg1: i32) -> (i32, i32) {
    %c0_i32 = arith.constant 0 : i32
    %c0_i32_0 = arith.constant 0 : i32
    return %arg1, %c0_i32 : i32, i32
  }
  func.func @transform_6(%arg0: i32, %arg1: i32) -> (i32, i32) {
    %c0_i32 = arith.constant 0 : i32
    %c0_i32_0 = arith.constant 0 : i32
    return %arg1, %c0_i32 : i32, i32
  }
}

</mosaic_0001>

<bundles_post_ra>
// kernel: tpu_custom_call.1
= control target key start
LH: loop header
LB: loop body
LE: loop exit
PB: predicated region body
PF: predicated region fallthrough
CT: control target
= control target key end

     0   :  { %s2199_s0 = inlined_call_operand.hbm [shape: bf16[128,128], index: 0, kind: input, shape index: {}]   ;;  %s2200_s1 = inlined_call_operand.hbm [shape: bf16[2,128,128], index: 1, kind: input, shape index: {}]   ;;  %s2201_s2 = inlined_call_operand.vmem [shape: f32[2,1,128], index: 2, kind: input, shape index: {}]   ;;  %s2202_s3 = inlined_call_operand.hbm [shape: f32[2,1,128], index: 3, kind: input, shape index: {}]   ;;  %s2203_s4 = inlined_call_operand.hbm [shape: f32[2,1,128], index: 4, kind: input, shape index: {}]   ;;  %s2204_s5 = inlined_call_operand.vmem [shape: s8[16,128], index: 5, kind: input, shape index: {}]   ;;  %s2205_s6 = inlined_call_operand.hbm [shape: bf16[16,128], index: 6, kind: output, shape index: {}]  }
   0x1   :  { %2210 = sst [smem:[#allocation19_spill]] %s2199_s0 }
   0x2   :  { %2211 = sst [smem:[#allocation20_spill]] %s2200_s1 }
   0x3   :  { %11 = vsyncpa [#allocation7], 0 }
   0x4   :  { %12 = vsyncpa [#allocation10], 0 }
   0x5   :  { %14 = vsyncpa [#allocation10 + $0x1], 0 }
   0x6   :  { %15 = vsyncpa [#allocation13], 0 }
   0x7   :  { %17 = vsyncpa [#allocation13 + $0x1], 0 }
   0x8   :  { %18 = vsyncpa [#allocation8], 0  ;;  %s1859_s21 = smov 0   ;;  %s1861_s22 = smov 0  }
   0x9   :  { %s1863_s23 = smov 0   ;;  %s1865_s24 = smov 0  }
   0xa   :  { %s1867_s25 = smov 0   ;;  %s1869_s26 = smov 0  }
   0xb LB: > { %s36_s27 = sadd.s32 1, %s1806_s25  ;;  %s64_s28 = sadd.s32 1, %s1798_s23  ;;  %s1810_s26 = sphi %s1869_s26, %s24_s26   ;;  %s1806_s25 = sphi %s1867_s25, %s2228_s25   ;;  %s1802_s24 = sphi %s1865_s24, %s2227_s24   ;;  %s1798_s23 = sphi %s1863_s23, %s2226_s23   ;;  %s1794_s22 = sphi %s1861_s22, %s2225_s22   ;;  %s1790_s21 = sphi %s1859_s21, %s2224_s21  }
   0xc   : > { %p38_p0 = scmp.ge.s32.totalorder %s36_s27, 2  ;;  %p71_p1 = scmp.ne.s32.totalorder %s1798_s23, %s1794_s22 }
   0xd   : > { %p72_p2 = scmp.eq.s32.totalorder %s1810_s26, 0  ;;  %p1519_p5 = scmp.lt.s32.totalorder %s1810_s26, 2 }
   0xe   : > { %s2230_s27 = smov (%p38_p0, %s36_s27), 0  ;;  %s253_s7 = sand.u32 1, %s1810_s26  }
   0xf   : > { %p1896_p3 = por %p72_p2, %p71_p1  ;;  %s61_s30 = ssub.s32 %s1806_s25, %s2230_s27 }
  0x10   : > { %p62_p4 = scmp.eq.s32.totalorder %s61_s30, 0  ;;  %s1905_s8 = sand.u32 1, %s1798_s23  }
  0x11   : > { %s1226_s10 = sshll.u32 %s1905_s8, 6  ;;  %s1284_s11 = sshll.u32 %s1806_s25, 10 }
  0x12   : > { %s1908_s9 = scalar_select %p62_p4, %s1798_s23, %s64_s28  }
  0x13   : > { %s2213_s1 = sld [smem:[#allocation20_spill]]  ;;  %s257_s15 = scalar_lea.vmem [#allocation9], %s1226_s10 }
  0x14   : > { %s264_s16 = sshll.u32 %s257_s15, 4  ;;  %p1917_p6 = pnand %p1519_p5, %p1896_p3  ;;  %s265_s16 = int_to_ptr.vmem [resolvable:$true] %s264_s16 }
  0x15   : > { %s1921_s18 = scalar_lea.sflag [#allocation10], %s253_s7  ;;  %s1627_s19 = scalar_lea.vmem %s265_s16, 1024 }
  0x16   : > { %p2206_p7 = pneg %p1917_p6  ;;  %p1628_p8 = scmp.ne.s32.totalorder %s265_s16, %s1627_s19 }
  0x17   : > { %s1812_s20 = smov [#allocation9]  }
  0x18   : > { %p1630_p9 = pnand %p1628_p8, %p2206_p7  ;;  %s1632_s28 = sshll.u32 %s1812_s20, 4  ;;  %s1633_s28 = int_to_ptr.vmem [resolvable:$false] %s1632_s28 }
  0x19   : > { %s263_s14 = scalar_lea.hbm %s2213_s1, %s1284_s11  ;;  %s1634_s29 = scalar_lea.vmem %s1633_s28, 2048 }
  0x1a   : > { %p1631_p10 = pneg %p1630_p9  ;;  %p1635_p11 = scmp.lt.s32.totalorder %s265_s16, %s1633_s28 }
  0x1b   : > { %p1636_p12 = scmp.lt.s32.totalorder %s1634_s29, %s1627_s19 }
  0x1d   : > { %p1637_p13 = por %p1636_p12, %p1635_p11 }
  0x1f   : > { %p1638_p0 = pnand %p1637_p13, %p1631_p10 }
  0x21   : > { %1641 = shalt.err (!%p1638_p0)
}
  0x22   : > { %s1813_s30 = smov 64   ;;  %s1814_s7 = smov 4  }
  0x23   : > { %1511 = dma.hbm_to_vmem [thread:$0]  (!%p1917_p6), %s263_s14, 1024, %s265_s16, %s1921_s18, %s1813_s30, %s1813_s30, %s1814_s7  }
  0x24   : > { %s1935_s10 = sadd.s32 4294967295, %s1810_s26   ;;  %p77_p1 = scmp.ne.s32.totalorder %s1794_s22, %s1790_s21 }
  0x25   : > { %p2207_p2 = scmp.eq.s32.totalorder %s1935_s10, 0  ;;  %p1222_p3 = scmp.ge.s32.totalorder %s1810_s26, 1 }
  0x26   : > { %p218_p4 = scmp.lt.s32.totalorder %s1810_s26, 3  ;;  %s1815_s13 = smov [#allocation6]  }
  0x27   : > { %p1944_p5 = por %p2207_p2, %p77_p1  ;;  %s230_s14 = sshll.u32 %s1815_s13, 4  ;;  %s231_s14 = int_to_ptr.vmem [resolvable:$true] %s230_s14 }
  0x28   : > { %p1948_p8 = pnand %p1222_p3, %p218_p4  ;;  %s2209_s15 = sshll.u32 %s1806_s25, 4 }
  0x29   : > { %s2215_s11 = scalar_select %p1944_p5, 1, 0 }
  0x2a   : > { %p1504_p9 = pneg %p1948_p8  ;;  %s283_s21 = scalar_lea.vmem [#allocation11], %s1905_s8 }
  0x2b   : > { %s290_s16 = sshll.u32 %s283_s21, 4  ;;  %s288_s28 = scalar_lea.hbm %s2202_s3, %s2209_s15  ;;  %s291_s16 = int_to_ptr.vmem [resolvable:$true] %s290_s16 }
  0x2c   : > { %p1505_p10 = pnand %p1504_p9, %p2207_p2  ;;  %s1653_s29 = scalar_lea.vmem %s231_s14, 1024 }
  0x2d   : > { %p1654_p12 = scmp.ne.s32.totalorder %s231_s14, %s1653_s29  ;;  %p1661_p1 = scmp.lt.s32.totalorder %s231_s14, %s231_s14 }
  0x2e   : > { %p1644_p11 = pneg %p1505_p10  ;;  %p1662_p3 = scmp.lt.s32.totalorder %s1653_s29, %s1653_s29 }
  0x30   : > { %p1656_p13 = pnand %p1654_p12, %p1644_p11  ;;  %p1663_p4 = por %p1662_p3, %p1661_p1 }
  0x32   : > { %p1657_p0 = pneg %p1656_p13 }
  0x34   : > { %p1664_p7 = pnand %p1663_p4, %p1657_p0 }
  0x36   : > { %1667 = shalt.err (!%p1664_p7)
}
  0x37   : > { %s2217_s0 = sld [smem:[#allocation19_spill]]  ;;  %s1681_s19 = scalar_lea.vmem %s291_s16, 16 }
  0x38   : > { %p1682_p9 = scmp.ne.s32.totalorder %s291_s16, %s1681_s19  ;;  %p2218_p2 = pneg %p1917_p6 }
  0x39   : > { %s1816_s20 = smov [#allocation11]  }
  0x3a   : > { %p1684_p5 = pnand %p1682_p9, %p2218_p2  ;;  %s1686_s15 = sshll.u32 %s1816_s20, 4  ;;  %s1687_s15 = int_to_ptr.vmem [resolvable:$false] %s1686_s15 }
  0x3b   : > { %s1688_s29 = scalar_lea.vmem %s1687_s15, 32  ;;  %p1689_p12 = scmp.lt.s32.totalorder %s291_s16, %s1687_s15 }
  0x3c   : > { %p1685_p11 = pneg %p1684_p5  ;;  %p1690_p7 = scmp.lt.s32.totalorder %s1688_s29, %s1681_s19 }
  0x3d   : > { %1507 = dma.hbm_to_vmem [thread:$0]  (!%p1505_p10), %s2217_s0, 1024, %s231_s14, [#allocation7], %s1813_s30, %s1813_s30, %s1814_s7  }
  0x3e   : > { %p1691_p13 = por %p1690_p7, %p1689_p12 }
  0x40   : > { %p1692_p0 = pnand %p1691_p13, %p1685_p11 }
  0x42   : > { %1695 = shalt.err (!%p1692_p0)
}
  0x43   : > { %1514 = dma.hbm_to_vmem [thread:$0]  (!%p1917_p6), %s288_s28, 16, %s291_s16, %s1921_s18  }
  0x44   : > { %s2219_s30 = sshll.u32 %s1806_s25, 4  ;;  %s300_s21 = scalar_lea.vmem [#allocation12], %s1905_s8 }
  0x45   : > { %s305_s13 = scalar_lea.hbm %s2203_s4, %s2219_s30  ;;  %s307_s20 = sshll.u32 %s300_s21, 4  ;;  %s308_s20 = int_to_ptr.vmem [resolvable:$true] %s307_s20 }
  0x46   : > { %s298_s15 = scalar_lea.sflag [#allocation13], %s1905_s8  ;;  %s1709_s19 = scalar_lea.vmem %s308_s20, 16 }
  0x47   : > { %p1710_p2 = scmp.ne.s32.totalorder %s308_s20, %s1709_s19  ;;  %p2220_p5 = pneg %p1917_p6 }
  0x48   : > { %s1817_s29 = smov [#allocation12]  }
  0x49   : > { %p1712_p10 = pnand %p1710_p2, %p2220_p5  ;;  %s1714_s0 = sshll.u32 %s1817_s29, 4  ;;  %s1715_s0 = int_to_ptr.vmem [resolvable:$false] %s1714_s0 }
  0x4a   : > { %s1716_s1 = scalar_lea.vmem %s1715_s0, 32  ;;  %p1717_p3 = scmp.lt.s32.totalorder %s308_s20, %s1715_s0 }
  0x4b   : > { %p1713_p1 = pneg %p1712_p10  ;;  %p1718_p4 = scmp.lt.s32.totalorder %s1716_s1, %s1709_s19 }
  0x4d   : > { %p1719_p9 = por %p1718_p4, %p1717_p3 }
  0x4f   : > { %p1720_p11 = pnand %p1719_p9, %p1713_p1 }
  0x51   : > { %1723 = shalt.err (!%p1720_p11)
}
  0x52   : > { %1517 = dma.hbm_to_vmem [thread:$0]  (!%p1917_p6), %s305_s13, 16, %s308_s20, %s298_s15  }
  0x53   : > { %316 = sbr.rel (%p1948_p8) target bundleno = 1152 (0x480), region = 44  ;;  %p2221_p12 = scmp.eq.s32.totalorder (!%p1948_p8), %s1935_s10, 0 }
  0x58   : > { %1773 = dma.done.wait (%p2221_p12), [#allocation7], 1024   ;;  %p2222_p7 = pmov %p2221_p12 }
  0x59   : > { %s322_s0 = sand.u32 1, %s1935_s10   ;;  %s1995_s1 = sand.u32 1, %s1794_s22  }
  0x5a   : > { %1775 = vsyncadd (%p2222_p7), [#allocation7], 4294966272  ;;  %s1233_s8 = sshll.u32 %s1995_s1, 6  ;;  %s323_s18 = scalar_lea.sflag [#allocation10], %s322_s0 }
  0x5b   : > { %s1998_s17 = scalar_lea.vmem [#allocation9], %s1233_s8  ;;  %p2223_p6 = scmp.ne.s32.totalorder %s2215_s11, 0 }
  0x5d   : > { %1777 = dma.done.wait (%p2223_p6), %s323_s18, 1040  }
  0x5e   : > { %1779 = vsyncadd (%p2223_p6), %s323_s18, 4294966256  ;;  %s334_s12 = scalar_lea.vmem [#allocation11], %s1995_s1  ;;  %s340_s16 = scalar_lea.sflag [#allocation13], %s1995_s1 }
  0x5f   : > { %s342_s28 = scalar_lea.vmem [#allocation12], %s1995_s1 }
  0x60   : > { %1781 = dma.done.wait (%p2223_p6), %s340_s16, 16  }
  0x61   : > { %1783 = vsyncadd (%p2223_p6), %s340_s16, 4294967280  ;;  %p382_p8 = scmp.lt.s32.totalorder %s1802_s24, 1  ;;  %p395_p13 = scmp.eq.s32.totalorder %s1802_s24, 0 }
  0x62   : > { %v401_v0 = vld [vmem:[#allocation6] sm:$0xff] (%p395_p13)   ;;  %v403_v1 = vld [vmem:[#allocation6 + $0x8] sm:$0xff] (%p395_p13)   ;;  %v405_v2 = vld [vmem:[#allocation6 + $0x10] sm:$0xff] (%p395_p13)  }
  0x63   : > { %s2232_s24 = smov (!%p382_p8, %s1802_s24), 1  ;;  %400 = sbr.rel (!%p395_p13) target bundleno = 104 (0x68), region = 64  ;;  %417 = vst [vmem:[#allocation2] sm:$0xff] (%p395_p13), %v401_v0   ;;  %419 = vst [vmem:[#allocation2 + $0x8] sm:$0xff] (%p395_p13), %v403_v1   ;;  %v407_v3 = vld [vmem:[#allocation6 + $0x18] sm:$0xff] (%p395_p13)   ;;  %v409_v4 = vld [vmem:[#allocation6 + $0x20] sm:$0xff] (%p395_p13)  }
  0x64   : > { %s384_s14 = scalar_lea.vmem %s2201_s2, %s2232_s24  ;;  %421 = vst [vmem:[#allocation2 + $0x10] sm:$0xff] (%p395_p13), %v405_v2   ;;  %v411_v5 = vld [vmem:[#allocation6 + $0x28] sm:$0xff] (%p395_p13)   ;;  %423 = vst [vmem:[#allocation2 + $0x18] sm:$0xff] (%p395_p13), %v407_v3   ;;  %v413_v6 = vld [vmem:[#allocation6 + $0x30] sm:$0xff] (%p395_p13)  }
  0x65   : > { %425 = vst [vmem:[#allocation2 + $0x20] sm:$0xff] (%p395_p13), %v409_v4   ;;  %427 = vst [vmem:[#allocation2 + $0x28] sm:$0xff] (%p395_p13), %v411_v5   ;;  %v415_v7 = vld [vmem:[#allocation6 + $0x38] sm:$0xff] (%p395_p13)  }
  0x66   : > { %429 = vst [vmem:[#allocation2 + $0x30] sm:$0xff] (%p395_p13), %v413_v6   ;;  %431 = vst [vmem:[#allocation2 + $0x38] sm:$0xff] (%p395_p13), %v415_v7  }
  0x68 PF: > { %v1582_v8 = vld [vmem:[%s1998_s17 + $0x38] sm:$0xff]   ;;  %v1583_v9 = vld [vmem:[%s1998_s17 + $0x30] sm:$0xff]   ;;  %v1584_v10 = vld [vmem:[%s1998_s17 + $0x28] sm:$0xff]   ;;  %v1818_v24 = vmov 0.0   ;;  %vm1819_vm0 = vmmov 0   ;;  %v1820_v49 = vmov 0  }
  0x69   : > { %1403 = vmatprep.subr.bf16.mxu0 %v1582_v8  ;;  %v1585_v11 = vld [vmem:[%s1998_s17 + $0x20] sm:$0xff]   ;;  %v1586_v13 = vld [vmem:[%s1998_s17 + $0x18] sm:$0xff]   ;;  %v1587_v14 = vld [vmem:[%s1998_s17 + $0x10] sm:$0xff]   ;;  %1435 = vmatprep.subr.mxu1 %v1818_v24  ;;  %vm868_vm1 = vcmask 7168   ;;  %s1821_s24 = smov [#allocation14]   ;;  %p1521_p0 = scmp.eq.s32.totalorder %s1935_s10, 1 }
  0x6a   : > { %1404 = vmatpush3.bf16.msra.mxu0 %v1582_v8  ;;  %v1590_v12 = vld [vmem:[#allocation2] sm:$0xff]   ;;  %v1588_v15 = vld [vmem:[%s1998_s17 + $0x8] sm:$0xff]   ;;  %1467 = vmatprep.mubr.msk.f32.mxu1 %vm1819_vm0, %v1818_v24  ;;  %s1080_s29 = sshll.u32 %s1821_s24, 4  ;;  %s1081_s29 = int_to_ptr.vmem [resolvable:$true] %s1080_s29 }
  0x6b   : > { %1405 = vmatprep.subr.bf16.mxu0 %v1583_v9  ;;  %1419 = vmatprep.mubr.bf16.mxu0 %v1590_v12  ;;  %v1589_v16 = vld [vmem:[%s1998_s17] sm:$0xff]   ;;  %v1592_v18 = vld [vmem:[#allocation2 + $0x10] sm:$0xff]   ;;  %v1593_v19 = vld [vmem:[#allocation2 + $0x18] sm:$0xff]   ;;  %s1724_s0 = scalar_lea.vmem %s1081_s29, 128  ;;  %p1731_p1 = scmp.lt.s32.totalorder %s1081_s29, %s1081_s29 }
  0x6c   : > { %v1591_v17 = vld [vmem:[#allocation2 + $0x8] sm:$0xff]   ;;  %v1594_v20 = vld [vmem:[#allocation2 + $0x20] sm:$0xff]   ;;  %1580 = vset.pattern.permute.xlu1 %v1820_v49  ;;  %1581 = vset.pattern.permute.xlu0 %v1820_v49  ;;  %p1725_p2 = scmp.ne.s32.totalorder %s1081_s29, %s1724_s0  ;;  %p1732_p3 = scmp.lt.s32.totalorder %s1724_s0, %s1724_s0 }
  0x6d   : > { %v1595_v21 = vld [vmem:[#allocation2 + $0x28] sm:$0xff]   ;;  %v1596_v22 = vld [vmem:[#allocation2 + $0x30] sm:$0xff]   ;;  %v1597_v23 = vld [vmem:[#allocation2 + $0x38] sm:$0xff]  }
  0x6e   : > { %1406 = vmatpush3.bf16.msra.mxu0 %v1583_v9  ;;  %v2038_v27 = vld [vmem:[%s334_s12] ss:$0 sm:$0xff]  ;;  %p1726_p5 = pnand %p1725_p2, %p1521_p0  ;;  %p1733_p4 = por %p1732_p3, %p1731_p1 }
  0x6f   : > { %1407 = vmatprep.subr.bf16.mxu0 %v1584_v10  ;;  %v741_v8 = vld [vmem:[%s384_s14] sm:$0x1] }
  0x70   : > { %p1727_p10 = pneg %p1726_p5 }
  0x72   : > { %1408 = vmatpush3.bf16.msra.mxu0 %v1584_v10  ;;  %p1734_p9 = pnand %p1733_p4, %p1727_p10 }
  0x73   : > { %1409 = vmatprep.subr.bf16.mxu0 %v1585_v11 }
  0x76   : > { %1410 = vmatpush3.bf16.msra.mxu0 %v1585_v11 }
  0x77   : > { %1411 = vmatprep.subr.bf16.mxu0 %v1586_v13 }
  0x7a   : > { %1412 = vmatpush3.bf16.msra.mxu0 %v1586_v13  ;;  %v913_v13 = vld [vmem:[%s2204_s5 + $0x2] sm:$0x3] }
  0x7b   : > { %1413 = vmatprep.subr.bf16.mxu0 %v1587_v14  ;;  %vm915_vm2 = vnez %v913_v13 }
  0x7e   : > { %1414 = vmatpush3.bf16.msra.mxu0 %v1587_v14  ;;  %v912_v14 = vld [vmem:[%s2204_s5] sm:$0x3] }
  0x7f   : > { %1415 = vmatprep.subr.bf16.mxu0 %v1588_v15  ;;  %vm914_vm3 = vnez %v912_v14 }
  0x82   : > { %1416 = vmatpush3.bf16.msra.mxu0 %v1588_v15 }
  0x83   : > { %1417 = vmatprep.subr.bf16.mxu0 %v1589_v16 }
  0x86   : > { %1418 = vmatpush3.bf16.msra.mxu0 %v1589_v16 }
  0x87   : > { %1470 = vmatprep.subr.bf16.mxu0 %v1818_v24 }
  0x89   : > { %1420 = vmatmul.mubr.bf16.vlgmr.msra.gmra.mxu0 %v1591_v17 }
  0x8a   : > { %1423 = vmatprep.mubr.bf16.mxu0 %v1592_v18  ;;  %v917_v18 = vsel %vm915_vm2, 16843009, %v1820_v49 }
  0x91   : > { %1424 = vmatmul.mubr.bf16.gmra.mxu0 %v1593_v19  ;;  %v916_v19 = vsel %vm914_vm3, 16843009, %v1820_v49 }
  0x92   : > { %1427 = vmatprep.mubr.bf16.mxu0 %v1594_v20 }
  0x99   : > { %1428 = vmatmul.mubr.bf16.gmra.mxu0 %v1595_v21 }
  0x9a   : > { %1431 = vmatprep.mubr.bf16.mxu0 %v1596_v22  ;;  %v919_v22 = vunpack.c.0.s8 %v917_v18 }
  0x9c   : > { %vm921_vm4 = vcmp.ne.s32.totalorder %v919_v22, 0 }
  0xa1   : > { %1432 = vmatmul.mubr.bf16.gmra.mxu0 %v1597_v23  ;;  %v918_v23 = vunpack.c.0.s8 %v916_v19 }
  0xa2   : > { %1486 = vmatprep.mubr.msk.bf16.mxu0 %vm1819_vm0, %v1818_v24 }
  0xa3   : > { %vm920_vm5 = vcmp.ne.s32.totalorder %v918_v23, 0 }
 0x149   : > { %v2032_v25 = vpop.f32.mrf.mxu0 }
 0x14b   : > { %v2034_v26 = vpop.f32.mrf.mxu0 }
 0x14c   : > { %v820_v28 = vmul.f32 %v2038_v27, %v2034_v26 }
 0x14d   : > { %v2042_v29 = vpop.f32.mrf.mxu0 }
 0x14e   : > { %v1312_v30 = vpack.c.bf16 %v2042_v29, %v2032_v25  ;;  %836 = vadd.xlane.f32.xlu0 %v820_v28 }
 0x14f   : > { %v2046_v31 = vpop.f32.mrf.mxu0 }
 0x150   : > { %1354 = vst [vmem:[#allocation3 + $0x8] sm:$0xff] %v1312_v30   ;;  %v1307_v32 = vpack.c.bf16 %v2046_v31, %v2034_v26  ;;  %v821_v33 = vmul.f32 %v2038_v27, %v2046_v31 }
 0x151   : > { %v2052_v34 = vpop.f32.mrf.mxu0 }
 0x152   : > { %1308 = vst [vmem:[#allocation3] sm:$0xff] %v1307_v32   ;;  %838 = vadd.xlane.f32.xlu0 %v821_v33  ;;  %v2056_v35 = vmul.f32 %v2052_v34, %v2038_v27 }
 0x153   : > { %v2058_v36 = vpop.f32.mrf.mxu0 }
 0x154   : > { %v2062_v37 = vmul.f32 %v2038_v27, %v2058_v36 }
 0x155   : > { %v2064_v38 = vpop.f32.mrf.mxu0 }
 0x156   : > { %v1322_v39 = vpack.c.bf16 %v2064_v38, %v2052_v34  ;;  %v2070_v40 = vmul.f32 %v2064_v38, %v2038_v27 }
 0x157   : > { %v2072_v41 = vpop.f32.mrf.mxu0  ;;  %v1604_v6 = vld [vmem:[#allocation3 + $0x8] sm:$0xff]  }
 0x158   : > { %1356 = vst [vmem:[#allocation3 + $0x18] sm:$0xff] %v1322_v39   ;;  %v1317_v42 = vpack.c.bf16 %v2072_v41, %v2058_v36  ;;  %v2078_v43 = vmul.f32 %v2038_v27, %v2072_v41 }
 0x159   : > { %v1429_v44 = vpop.f32.mrf.mxu0  ;;  %v1605_v7 = vld [vmem:[#allocation3] sm:$0xff]  }
 0x15a   : > { %1355 = vst [vmem:[#allocation3 + $0x10] sm:$0xff] %v1317_v42   ;;  %v2081_v45 = vmul.f32 %v1429_v44, %v2038_v27 }
 0x15b   : > { %v630_v46 = vpop.f32.mrf.mxu0 }
 0x15c   : > { %v2084_v47 = vmul.f32 %v2038_v27, %v630_v46 }
 0x15d   : > { %v1430_v48 = vpop.f32.mrf.mxu0 }
 0x15e   : > { %v1332_v50 = vpack.c.bf16 %v1430_v48, %v1429_v44  ;;  %v2089_v51 = vmul.f32 %v1430_v48, %v2038_v27 }
 0x15f   : > { %v633_v52 = vpop.f32.mrf.mxu0  ;;  %v1602_v4 = vld [vmem:[#allocation3 + $0x18] sm:$0xff]  }
 0x160   : > { %1358 = vst [vmem:[#allocation3 + $0x28] sm:$0xff] %v1332_v50   ;;  %v1327_v53 = vpack.c.bf16 %v633_v52, %v630_v46  ;;  %v2092_v54 = vmul.f32 %v2038_v27, %v633_v52 }
 0x161   : > { %v1433_v55 = vpop.f32.mrf.mxu0  ;;  %v1603_v5 = vld [vmem:[#allocation3 + $0x10] sm:$0xff]  }
 0x162   : > { %1357 = vst [vmem:[#allocation3 + $0x20] sm:$0xff] %v1327_v53   ;;  %v2095_v56 = vmul.f32 %v1433_v55, %v2038_v27 }
 0x163   : > { %v646_v57 = vpop.f32.mrf.mxu0 }
 0x164   : > { %v2098_v58 = vmul.f32 %v2038_v27, %v646_v57 }
 0x165   : > { %v1434_v59 = vpop.f32.mrf.mxu0 }
 0x166   : > { %v1342_v60 = vpack.c.bf16 %v1434_v59, %v1433_v55  ;;  %1436 = vmatpush3.xpose.msra.mxu1 %v1434_v59  ;;  %v2101_v61 = vmul.f32 %v1434_v59, %v2038_v27 }
 0x167   : > { %v2103_v62 = vpop.f32.mrf.mxu0  ;;  %1437 = vmatprep.subr.mxu1 %v1818_v24  ;;  %v1600_v2 = vld [vmem:[#allocation3 + $0x28] sm:$0xff]  }
 0x168   : > { %1360 = vst [vmem:[#allocation3 + $0x38] sm:$0xff] %v1342_v60   ;;  %v1337_v63 = vpack.c.bf16 %v2103_v62, %v646_v57 }
 0x169   : > { %v1601_v3 = vld [vmem:[#allocation3 + $0x20] sm:$0xff]  }
 0x16a   : > { %1359 = vst [vmem:[#allocation3 + $0x30] sm:$0xff] %v1337_v63   ;;  %1438 = vmatpush3.xpose.msra.mxu1 %v1433_v55  ;;  %v823_v55 = vmul.f32 %v2042_v29, %v2038_v27 }
 0x16b   : > { %1439 = vmatprep.subr.mxu1 %v1818_v24 }
 0x16e   : > { %1440 = vmatpush3.xpose.msra.mxu1 %v2103_v62 }
 0x16f   : > { %1441 = vmatprep.subr.mxu1 %v1818_v24  ;;  %v1598_v0 = vld [vmem:[#allocation3 + $0x38] sm:$0xff]  }
 0x170   : > { %1471 = vmatpush3.bf16.msra.mxu0 %v1598_v0 }
 0x171   : > { %1472 = vmatprep.subr.bf16.mxu0 %v1818_v24  ;;  %v1599_v1 = vld [vmem:[#allocation3 + $0x30] sm:$0xff]  }
 0x172   : > { %1442 = vmatpush3.xpose.msra.mxu1 %v646_v57 }
 0x173   : > { %1443 = vmatprep.subr.mxu1 %v1818_v24 }
 0x174   : > { %1473 = vmatpush3.bf16.msra.mxu0 %v1599_v1  ;;  %v1269_v1 = vld [vmem:[%s342_s28] ss:$0 sm:$0xff] }
 0x175   : > { %1474 = vmatprep.subr.bf16.mxu0 %v1818_v24 }
 0x176   : > { %1444 = vmatpush3.xpose.msra.mxu1 %v1430_v48 }
 0x177   : > { %1445 = vmatprep.subr.mxu1 %v1818_v24 }
 0x178   : > { %1475 = vmatpush3.bf16.msra.mxu0 %v1600_v2 }
 0x179   : > { %1476 = vmatprep.subr.bf16.mxu0 %v1818_v24 }
 0x17a   : > { %1446 = vmatpush3.xpose.msra.mxu1 %v1429_v44 }
 0x17b   : > { %1447 = vmatprep.subr.mxu1 %v1818_v24 }
 0x17c   : > { %1477 = vmatpush3.bf16.msra.mxu0 %v1601_v3 }
 0x17d   : > { %1478 = vmatprep.subr.bf16.mxu0 %v1818_v24 }
 0x17e   : > { %1448 = vmatpush3.xpose.msra.mxu1 %v633_v52 }
 0x17f   : > { %1449 = vmatprep.subr.mxu1 %v1818_v24 }
 0x180   : > { %1479 = vmatpush3.bf16.msra.mxu0 %v1602_v4 }
 0x181   : > { %1480 = vmatprep.subr.bf16.mxu0 %v1818_v24 }
 0x182   : > { %1450 = vmatpush3.xpose.msra.mxu1 %v630_v46 }
 0x183   : > { %1451 = vmatprep.subr.mxu1 %v1818_v24 }
 0x184   : > { %1481 = vmatpush3.bf16.msra.mxu0 %v1603_v5 }
 0x185   : > { %1482 = vmatprep.subr.bf16.mxu0 %v1818_v24 }
 0x186   : > { %1452 = vmatpush3.xpose.msra.mxu1 %v2064_v38 }
 0x187   : > { %1453 = vmatprep.subr.mxu1 %v1818_v24 }
 0x188   : > { %1483 = vmatpush3.bf16.msra.mxu0 %v1604_v6 }
 0x189   : > { %1484 = vmatprep.subr.bf16.mxu0 %v1818_v24 }
 0x18a   : > { %1454 = vmatpush3.xpose.msra.mxu1 %v2052_v34 }
 0x18b   : > { %1455 = vmatprep.subr.mxu1 %v1818_v24 }
 0x18c   : > { %1485 = vmatpush3.bf16.msra.mxu0 %v1605_v7 }
 0x18e   : > { %1456 = vmatpush3.xpose.msra.mxu1 %v2072_v41 }
 0x18f   : > { %1457 = vmatprep.subr.mxu1 %v1818_v24 }
 0x192   : > { %1458 = vmatpush3.xpose.msra.mxu1 %v2058_v36  ;;  %v833_v36 = vmul.f32 %v2038_v27, %v2103_v62 }
 0x193   : > { %1459 = vmatprep.subr.mxu1 %v1818_v24 }
 0x196   : > { %1460 = vmatpush3.xpose.msra.mxu1 %v2042_v29 }
 0x197   : > { %1461 = vmatprep.subr.mxu1 %v1818_v24 }
 0x19a   : > { %1462 = vmatpush3.xpose.msra.mxu1 %v2032_v25 }
 0x19b   : > { %1463 = vmatprep.subr.mxu1 %v1818_v24 }
 0x19e   : > { %1464 = vmatpush3.xpose.msra.mxu1 %v2046_v31 }
 0x19f   : > { %1465 = vmatprep.subr.mxu1 %v1818_v24 }
 0x1a2   : > { %1466 = vmatpush3.xpose.msra.mxu1 %v2034_v26 }
 0x1a5   : > { %1468 = vmatmul.mubr.f32.vlgmr.msra.gmra.mxu1 %v741_v8 }
 0x1d7   : > { %v837_v9 = vpop.xlane.xlu0 %836 }
 0x1d8   : > { %869 = vst.msk [vmem:[#allocation5] sm:$0xff] %vm868_vm1, %v837_v9 }
 0x1db   : > { %v839_v10 = vpop.xlane.xlu0 %838 }
 0x1dc   : > { %870 = vst.msk [vmem:[#allocation5 + $0x8] sm:$0xff] %vm868_vm1, %v839_v10 }
 0x1df   : > { %v887_v11 = vld [vmem:[#allocation5] sm:$0xff] }
 0x1e0   : > { %892 = vperm.xlu1 %1580, %v887_v11  }
 0x1e3   : > { %v888_v12 = vld [vmem:[#allocation5 + $0x8] sm:$0xff] }
 0x1e4   : > { %897 = vperm.xlu1 %1580, %v888_v12  }
 0x25b   : > { %v893_v16 = vpop.permute.xlu1 %892 }
 0x25f   : > { %v898_v20 = vpop.permute.xlu1 %897 }
 0x265   : > { %v808_v15 = vpop.f32.mrf.mxu1 }
 0x266   : > { %812 = vst [vmem:[#allocation4] sm:$0x1] %v808_v15 }
 0x267   : > { %v1469_v17 = vpop.f32.mrf.mxu1 }
 0x26d   : > { %v1268_v21 = vld [vmem:[#allocation4] ss:$0 sm:$0xff] }
 0x26e   : > { %v907_v24 = vadd.f32 %v1268_v21, %v898_v20  ;;  %v906_v26 = vadd.f32 %v1268_v21, %v893_v16 }
 0x270   : > { %v909_v28 = vmul.f32 0.2, %v907_v24  ;;  %v908_v30 = vmul.f32 0.2, %v906_v26 }
 0x272   : > { %v911_v31 = vmax.f32 %v907_v24, %v909_v28  ;;  %v910_v32 = vmax.f32 %v906_v26, %v908_v30 }
 0x274   : > { %v923_v33 = vsel %vm921_vm4, %v911_v31, -1e+30  ;;  %v922_v34 = vsel %vm920_vm5, %v910_v32, -1e+30 }
 0x275   : > { %926 = vmax.xlane.f32.xlu1 %v923_v33  ;;  %924 = vmax.xlane.f32.xlu0 %v922_v34 }
 0x279   : > { %854 = vadd.xlane.f32.xlu1 %v2092_v54  ;;  %v822_v54 = vmul.f32 %v2032_v25, %v2038_v27 }
 0x27d   : > { %858 = vadd.xlane.f32.xlu1 %v2089_v51 }
 0x281   : > { %862 = vadd.xlane.f32.xlu1 %v833_v36 }
 0x285   : > { %866 = vadd.xlane.f32.xlu1 %v2101_v61 }
 0x2fe   : > { %v927_v38 = vpop.xlane.xlu1 %926  ;;  %v925_v39 = vpop.xlane.xlu0 %924 }
 0x2ff   : > { %v928_v41 = vsub.f32 %v922_v34, %v925_v39  ;;  %v929_v42 = vsub.f32 %v923_v33, %v927_v38 }
 0x301   : > { %v930_v44 = vmul.f32 1.442695, %v928_v41  ;;  %v932_v48 = vmul.f32 1.442695, %v929_v42 }
 0x302   : > { %v855_v46 = vpop.xlane.xlu1 %854 }
 0x303   : > { %1606 = vpow2.f32 %v930_v44 }
 0x304   : > { %1608 = vpow2.f32 %v932_v48 }
 0x306   : > { %v859_v49 = vpop.xlane.xlu1 %858 }
 0x30a   : > { %v863_v50 = vpop.xlane.xlu1 %862 }
 0x30e   : > { %v867_v52 = vpop.xlane.xlu1 %866 }
 0x310   : > { %v1607_v53 = vpop.eup %1606 }
 0x311   : > { %934 = vadd.xlane.f32.xlu0 %v1607_v53  ;;  %v1609_v51 = vpop.eup %1608 }
 0x315   : > { %936 = vadd.xlane.f32.xlu0 %v1609_v51 }
 0x319   : > { %840 = vadd.xlane.f32.xlu0 %v822_v54 }
 0x31d   : > { %842 = vadd.xlane.f32.xlu0 %v823_v55 }
 0x321   : > { %844 = vadd.xlane.f32.xlu0 %v2062_v37 }
 0x325   : > { %846 = vadd.xlane.f32.xlu0 %v2078_v43 }
 0x329   : > { %848 = vadd.xlane.f32.xlu0 %v2056_v35 }
 0x32d   : > { %850 = vadd.xlane.f32.xlu0 %v2070_v40 }
 0x331   : > { %852 = vadd.xlane.f32.xlu0 %v2084_v47 }
 0x335   : > { %856 = vadd.xlane.f32.xlu0 %v2081_v45 }
 0x339   : > { %860 = vadd.xlane.f32.xlu0 %v2098_v58 }
 0x33d   : > { %864 = vadd.xlane.f32.xlu0 %v2095_v56 }
 0x39a   : > { %v935_v25 = vpop.xlane.xlu0 %934 }
 0x39b   : > { %1610 = vrcp.f32 %v935_v25 }
 0x39e   : > { %v937_v27 = vpop.xlane.xlu0 %936 }
 0x39f   : > { %1612 = vrcp.f32 %v937_v27 }
 0x3a2   : > { %v841_v29 = vpop.xlane.xlu0 %840 }
 0x3a6   : > { %v843_v37 = vpop.xlane.xlu0 %842 }
 0x3a8   : > { %v1611_v43 = vpop.eup %1610 }
 0x3a9   : > { %v940_v59 = vmul.f32 %v1611_v43, %v1607_v53 }
 0x3aa   : > { %v845_v57 = vpop.xlane.xlu0 %844 }
 0x3ac   : > { %v1613_v35 = vpop.eup %1612 }
 0x3ad   : > { %v941_v40 = vmul.f32 %v1613_v35, %v1609_v51 }
 0x3ae   : > { %v847_v60 = vpop.xlane.xlu0 %846 }
 0x3af   : > { %v942_v47 = vpack.c.bf16 %v941_v40, %v940_v59 }
 0x3b1   : > { %1487 = vmatmul.mubr.bf16.vlgmr.msra.gmra.mxu0 %v942_v47 }
 0x3b2   : > { %v849_v45 = vpop.xlane.xlu0 %848 }
 0x3b6   : > { %v851_v58 = vpop.xlane.xlu0 %850 }
 0x3ba   : > { %v853_v61 = vpop.xlane.xlu0 %852 }
 0x3be   : > { %v857_v56 = vpop.xlane.xlu0 %856 }
 0x3c2   : > { %v861_v62 = vpop.xlane.xlu0 %860 }
 0x3c6   : > { %v865_v63 = vpop.xlane.xlu0 %864 }
 0x471   : > { %v1048_v0 = vpop.f32.mrf.mxu0 }
 0x472   : > { %v1049_v4 = vadd.f32 %v1269_v1, %v1048_v0 }
 0x473   : > { %v1488_v2 = vpop.f32.mrf.mxu0 }
 0x475   : > { %v1051_v3 = vpop.f32.mrf.mxu0 }
 0x476   : > { %v1052_v5 = vadd.f32 %v1269_v1, %v1051_v3 }
 0x477   : > { %v1489_v6 = vpop.f32.mrf.mxu0 }
 0x478   : > { %v1347_v7 = vpack.c.bf16 %v1052_v5, %v1049_v4 }
 0x47a   : > { %1348 = vst [vmem:[#allocation14] sm:$0xff] %v1347_v7   ;;  %1353 = vst [vmem:[#allocation2] sm:$0xff] %v1347_v7  }
 0x47b   : > { %1737 = shalt.err (!%p1734_p9)
}
 0x47c   : > { %s1822_s1 = smov 64   ;;  %s1823_s8 = smov 4  }
 0x47d   : > { %1501 = dma.vmem_to_hbm [thread:$0]  (%p1521_p0), %s1081_s29, 128, %s2205_s6, [#allocation8], %s1822_s1, %s1822_s1, %s1823_s8  }
 0x47e   : > { %1785 = dma.done.wait (%p1521_p0), [#allocation8], 128  }
 0x47f   : > { %1787 = vsyncadd (%p1521_p0), [#allocation8], 4294967168 }
 0x480 PF: > { %s24_s26 = sadd.s32 1, %s1810_s26   ;;  %s2224_s21 = smov %s1794_s22 }
 0x481   : > { %p21_p11 = scmp.ge.s32.totalorder %s24_s26, 4   ;;  %s2225_s22 = smov %s1798_s23 }
 0x482   : > { %s2226_s23 = smov %s1908_s9  ;;  %s2227_s24 = smov %s1806_s25 }
 0x483   : > { %s2228_s25 = smov %s2230_s27  ;;  %23 = sbr.rel (!%p21_p11) target bundleno = 11 (0xb), region = 127 }
 0x488   :  { %1096 = vsyncpa [#allocation7], 1 }
 0x489   :  { %1098 = vsyncpa [#allocation7 + $0x1], 1 }
 0x48a   :  { %1099 = vsyncpa [#allocation10], 1 }
 0x48b   :  { %1101 = vsyncpa [#allocation10 + $0x1], 1 }
 0x48c   :  { %1102 = vsyncpa [#allocation13], 1 }
 0x48d   :  { %1104 = vsyncpa [#allocation13 + $0x1], 1 }
 0x48e   :  { %1105 = vsyncpa [#allocation8], 1 }
 0x48f   :  { %1107 = vsyncpa [#allocation8 + $0x1], 1 }

</bundles_post_ra>
